<compile_context>
chip_gen: v7x
topology: tpu7x:2x2x1
jax: 0.10.0
libtpu: 0.0.40
codegen_flags: <defaults>
</compile_context>

<pallas_src>
import functools
import math

import jax
import jax.numpy as jnp
from jax import lax
from jax.experimental import pallas as pl
from jax.experimental.pallas import tpu as pltpu


# ------------------------------- kernel ---------------------------------------
def _pe_add_kernel(x_ref, o_ref, *, d_model):
    """x_ref/o_ref: [block_rows, B*D] view of x. Adds pe[s, d] per element.

    lane l maps to (batch b = l // d_model, dim d = l % d_model); pe depends only
    on (sequence position, d), so it broadcasts over the batch for free.
    """
    bs, bd = x_ref.shape
    i = pl.program_id(0)

    # Global sequence position of every row in this block.
    pos = (i * bs + lax.broadcasted_iota(jnp.int32, (bs, bd), 0)).astype(jnp.float32)
    # Embedding-dim index of every lane.
    d = lax.broadcasted_iota(jnp.int32, (bs, bd), 1) % d_model
    parity = d % 2                                   # 0 -> sin slot, 1 -> cos slot
    # div_term[k] = exp(-2k * ln(10000)/D) evaluated at 2k = d - parity.
    inv_freq = jnp.exp((d - parity).astype(jnp.float32) * (-math.log(10000.0) / d_model))
    ang = pos * inv_freq
    pe = jnp.where(parity == 0, jnp.sin(ang), jnp.cos(ang))

    # TODO(synk): training-mode dropout(p=0.1) (pltpu.prng_* masking) not emitted;
    # eval-mode identity semantics are used, matching inference behavior.
    o_ref[...] = x_ref[...] + pe.astype(x_ref.dtype)


# --------------------------- "module init" (buffer) ----------------------------
def make_positional_encoding_table(d_model, max_len=5000, dtype=jnp.float32):
    """Exact port of the torch __init__ pe-buffer (used here as the pure-JAX ref)."""
    assert d_model % 2 == 0, "d_model must be even (the torch module also requires this)"
    position = jnp.arange(max_len, dtype=dtype)[:, None]                      # [L, 1]
    div_term = jnp.exp(jnp.arange(0, d_model, 2, dtype=dtype)
                       * (-math.log(10000.0) / d_model))                      # [D/2]
    ang = position * div_term                                                 # [L, D/2]
    pe = jnp.zeros((max_len, 1, d_model), dtype=dtype)
    pe = pe.at[:, 0, 0::2].set(jnp.sin(ang))
    pe = pe.at[:, 0, 1::2].set(jnp.cos(ang))
    return pe                                                                 # [L, 1, D]


# ----------------------------- sizing helpers ----------------------------------
def _vmem_budget_bytes():
    """Generation-aware VMEM budget (leave ~25% headroom); safe fallback 32 MiB."""
    try:
        cap = getattr(pltpu.get_tpu_info(), "vmem_capacity_bytes", None)
        if cap:
            return (int(cap) * 3) // 4        # ~48 MiB on v7x, ~96 MiB on v5e/v6e
    except Exception:
        pass
    return 32 * 1024 * 1024


def _choose_block_rows(S, row_bytes, vmem_budget_bytes):
    """Pick the seq block size in *bytes* (~8 MiB target), sublane-aligned, and
    guarantee >= 2 grid steps when S allows it (megacore on v7x)."""
    target_bytes = max(row_bytes, min(8 << 20, vmem_budget_bytes // 4))
    bs = max(8, (target_bytes // row_bytes) // 8 * 8)   # multiple of 8 sublanes
    if bs >= S:
        if S >= 16:
            # split the sequence into (at least) two multiple-of-8 blocks
            bs = ((-(-S // 2)) + 7) // 8 * 8
        else:
            bs = S                                       # single full-extent block
    return int(bs)


# ------------------------------- wrapper ---------------------------------------
def positional_encoding_forward(x, max_len=5000):
    """x: [S, B, D]. Returns x + pe[:S] (eval-mode dropout = identity)."""
    S, B, D = x.shape
    assert D % 2 == 0 and S <= max_len

    bd = B * D
    itemsize = jnp.dtype(x.dtype).itemsize
    row_bytes = bd * itemsize

    budget = _vmem_budget_bytes()
    bs = _choose_block_rows(S, row_bytes, budget)
    n_blocks = pl.cdiv(S, bs)
    block_bytes = bs * row_bytes
    # 2x double-buffered input + output blocks, plus slack.
    vmem_limit = int(min(budget, max(16 << 20, 6 * block_bytes)))

    x2 = x.reshape(S, bd)                                # free view: lane-dense layout
    kernel = functools.partial(_pe_add_kernel, d_model=D)

    out2 = pl.pallas_call(
        kernel,
        out_shape=jax.ShapeDtypeStruct((S, bd), x.dtype),
        grid=(n_blocks,),
        in_specs=[pl.BlockSpec((bs, bd), lambda i: (i, 0))],
        out_specs=pl.BlockSpec((bs, bd), lambda i: (i, 0)),
        input_output_aliases={0: 0},                     # in-place x += pe
        compiler_params=pltpu.CompilerParams(
            dimension_semantics=("parallel",),           # seq blocks shard across TCs
            vmem_limit_bytes=vmem_limit,
        ),
    )(x2)
    return out2.reshape(S, B, D)


# --------------------------------- main ----------------------------------------
if __name__ == "__main__":
    # shapes implied by the module's forward: x is [seq_len, batch, d_model]
    S, B, D = 8, 2, 32
    max_len = 5000  # torch default

    key = jax.random.PRNGKey(0)
    x = jax.random.normal(key, (S, B, D), dtype=jnp.float32)

    # pure-JAX reference (dropout = identity in eval mode); computed BEFORE the
    # kernel call since the input buffer may be aliased/donated in place.
    pe = make_positional_encoding_table(D, max_len=max_len)
    ref = x + pe[:S]

    out = positional_encoding_forward(x, max_len=max_len)
    out = jax.block_until_ready(out)

    assert out.shape == (S, B, D) and out.dtype == jnp.float32
    assert bool(jnp.allclose(out, ref, atol=1e-5, rtol=1e-5))
    print("KERNEL_OK")
</pallas_src>

<mosaic_0001>
module attributes {stable_mosaic.version = 11 : i64} {
  func.func @_pe_add_kernel(%arg0: i32, %arg1: memref<8x64xf32, #tpu.memory_space<vmem>>, %arg2: memref<8x64xf32, #tpu.memory_space<vmem>>) attributes {dimension_semantics = [#tpu.dimension_semantics<parallel>], iteration_bounds = array<i64: 1>, scalar_prefetch = 0 : i64, scratch_operands = 0 : i64, tpu.core_type = #tpu.core_type<tc>, window_params = [{transform_indices = @transform_0, window_bounds = array<i64: 8, 64>}, {transform_indices = @transform_1, window_bounds = array<i64: 8, 64>}]} {
    %c8_i32 = arith.constant 8 : i32
    %0 = arith.muli %arg0, %c8_i32 : i32
    %1 = tpu.iota {dimensions = array<i32: 0>} : vector<8x64xi32>
    %2 = vector.broadcast %0 : i32 to vector<8x64xi32>
    %3 = arith.addi %2, %1 : vector<8x64xi32>
    %4 = arith.sitofp %3 : vector<8x64xi32> to vector<8x64xf32>
    %5 = tpu.iota {dimensions = array<i32: 1>} : vector<8x64xi32>
    %c32_i32 = arith.constant 32 : i32
    %c0_i32 = arith.constant 0 : i32
    %6 = arith.cmpi eq, %c32_i32, %c0_i32 : i32
    %c1_i32 = arith.constant 1 : i32
    %7 = arith.select %6, %c1_i32, %c32_i32 : i32
    %8 = vector.broadcast %7 : i32 to vector<8x64xi32>
    %9 = arith.remsi %5, %8 : vector<8x64xi32>
    %c0_i32_0 = arith.constant 0 : i32
    %10 = vector.broadcast %c0_i32_0 : i32 to vector<8x64xi32>
    %11 = arith.cmpi ne, %9, %10 : vector<8x64xi32>
    %c0_i32_1 = arith.constant 0 : i32
    %12 = vector.broadcast %c0_i32_1 : i32 to vector<8x64xi32>
    %13 = arith.cmpi slt, %9, %12 : vector<8x64xi32>
    %c0_i32_2 = arith.constant 0 : i32
    %14 = arith.cmpi slt, %7, %c0_i32_2 : i32
    %15 = vector.broadcast %14 : i1 to vector<8x64xi1>
    %16 = vector.broadcast %15 : vector<8x64xi1> to vector<8x64xi1>
    %17 = arith.xori %13, %16 : vector<8x64xi1>
    %18 = arith.andi %17, %11 : vector<8x64xi1>
    %19 = vector.broadcast %7 : i32 to vector<8x64xi32>
    %20 = arith.addi %9, %19 : vector<8x64xi32>
    %21 = arith.select %18, %20, %9 : vector<8x64xi1>, vector<8x64xi32>
    %c2_i32 = arith.constant 2 : i32
    %c0_i32_3 = arith.constant 0 : i32
    %22 = arith.cmpi eq, %c2_i32, %c0_i32_3 : i32
    %c1_i32_4 = arith.constant 1 : i32
    %23 = arith.select %22, %c1_i32_4, %c2_i32 : i32
    %24 = vector.broadcast %23 : i32 to vector<8x64xi32>
    %25 = arith.remsi %21, %24 : vector<8x64xi32>
    %c0_i32_5 = arith.constant 0 : i32
    %26 = vector.broadcast %c0_i32_5 : i32 to vector<8x64xi32>
    %27 = arith.cmpi ne, %25, %26 : vector<8x64xi32>
    %c0_i32_6 = arith.constant 0 : i32
    %28 = vector.broadcast %c0_i32_6 : i32 to vector<8x64xi32>
    %29 = arith.cmpi slt, %25, %28 : vector<8x64xi32>
    %c0_i32_7 = arith.constant 0 : i32
    %30 = arith.cmpi slt, %23, %c0_i32_7 : i32
    %31 = vector.broadcast %30 : i1 to vector<8x64xi1>
    %32 = vector.broadcast %31 : vector<8x64xi1> to vector<8x64xi1>
    %33 = arith.xori %29, %32 : vector<8x64xi1>
    %34 = arith.andi %33, %27 : vector<8x64xi1>
    %35 = vector.broadcast %23 : i32 to vector<8x64xi32>
    %36 = arith.addi %25, %35 : vector<8x64xi32>
    %37 = arith.select %34, %36, %25 : vector<8x64xi1>, vector<8x64xi32>
    %38 = arith.subi %21, %37 : vector<8x64xi32>
    %39 = arith.sitofp %38 : vector<8x64xi32> to vector<8x64xf32>
    %cst = arith.constant -0.287823141 : f32
    %40 = vector.broadcast %cst : f32 to vector<8x64xf32>
    %41 = arith.mulf %39, %40 : vector<8x64xf32>
    %42 = math.exp %41 : vector<8x64xf32>
    %43 = arith.mulf %4, %42 : vector<8x64xf32>
    %c0_i32_8 = arith.constant 0 : i32
    %44 = vector.broadcast %c0_i32_8 : i32 to vector<8x64xi32>
    %45 = arith.cmpi eq, %37, %44 : vector<8x64xi32>
    %46 = math.sin %43 : vector<8x64xf32>
    %47 = math.cos %43 : vector<8x64xf32>
    %48 = arith.select %45, %46, %47 : vector<8x64xi1>, vector<8x64xf32>
    %c0 = arith.constant 0 : index
    %c0_9 = arith.constant 0 : index
    %49 = vector.load %arg1[%c0, %c0_9] : memref<8x64xf32, #tpu.memory_space<vmem>>, vector<8x64xf32>
    %50 = arith.addf %49, %48 : vector<8x64xf32>
    %c0_10 = arith.constant 0 : index
    %c0_11 = arith.constant 0 : index
    %51 = vector.load %arg2[%c0_10, %c0_11] : memref<8x64xf32, #tpu.memory_space<vmem>>, vector<8x64xf32>
    tpu.vector_store %arg2[%c0_10, %c0_11], %50 {strides = array<i32>} : memref<8x64xf32, #tpu.memory_space<vmem>>, vector<8x64xf32>,
    return
  }
  func.func @transform_0(%arg0: i32) -> (i32, i32) {
    %c0_i32 = arith.constant 0 : i32
    %c0_i32_0 = arith.constant 0 : i32
    return %arg0, %c0_i32 : i32, i32
  }
  func.func @transform_1(%arg0: i32) -> (i32, i32) {
    %c0_i32 = arith.constant 0 : i32
    %c0_i32_0 = arith.constant 0 : i32
    return %arg0, %c0_i32 : i32, i32
  }
}

</mosaic_0001>

<bundles_post_ra>
// kernel: tpu_custom_call.1
= control target key start
LH: loop header
LB: loop body
LE: loop exit
PB: predicated region body
PF: predicated region fallthrough
CT: control target
= control target key end

     0   :  { %6 = vsyncpa [#allocation3], 0  ;;  %s428_s0 = inlined_call_operand.hbm [shape: f32[8,64], index: 0, kind: input, shape index: {}, may-alias: {0,1}]   ;;  %s429_s1 = inlined_call_operand.hbm [shape: f32[8,64], index: 1, kind: output, shape index: {}, may-alias: {0,1}]  }
   0x1   :  { %7 = vsyncpa [#allocation4], 0  ;;  %s361_s6 = smov [#allocation2]   ;;  %s313_s10 = scalar_lea.hbm %s428_s0, 128 }
   0x2   :  { %s14_s7 = sshll.u32 %s361_s6, 4  ;;  %p314_p0 = scmp.ne.s32.totalorder %s428_s0, %s313_s10  ;;  %s15_s7 = int_to_ptr.vmem [resolvable:$true] %s14_s7 }
   0x3   :  { %p317_p1 = scmp.lt.u32.totalorder %s313_s10, %s428_s0 }
   0x5   :  { %p319_p2 = pnand %p317_p1, %p314_p0 }
   0x7   :  { %322 = shalt.err (!%p319_p2)
}
   0x8   :  { %s323_s15 = scalar_lea.vmem %s15_s7, 128  ;;  %p328_p4 = scmp.lt.s32.totalorder %s15_s7, %s15_s7 }
   0x9   :  { %p324_p3 = scmp.ne.s32.totalorder %s15_s7, %s323_s15  ;;  %p329_p5 = scmp.lt.s32.totalorder %s323_s15, %s323_s15 }
   0xb   :  { %p330_p6 = por %p329_p5, %p328_p4 }
   0xd   :  { %p331_p7 = pnand %p330_p6, %p324_p3 }
   0xf   :  { %334 = shalt.err (!%p331_p7)
}
  0x10   :  { %17 = dma.hbm_to_vmem [thread:$0]  %s428_s0, 128, %s15_s7, [#allocation3]  }
  0x11   :  { %357 = dma.done.wait [#allocation3], 128  }
  0x12   :  { %358 = vsyncadd [#allocation3], 4294967168  ;;  %v22_v0 = vlaneseq  ;;  %v362_v23 = vmov 683565275   ;;  %v363_v25 = vmov 2475754826  }
  0x13   :  { %v364_v27 = vmov 2131351028   ;;  %v365_v29 = vmov 2102212464   ;;  %v366_v31 = vmov 920167782  }
  0x14   :  { %v28_v1 = vand.u32 127, %v22_v0  ;;  %v23_v8 = vshrl.u32 %v22_v0, 7  ;;  %v367_v38 = vmov 1326507024   ;;  %s368_s0 = smov [#allocation5]  }
  0x15   :  { %s278_s18 = sshll.u32 %s368_s0, 4  ;;  %s279_s18 = int_to_ptr.vmem [resolvable:$true] %s278_s18 }
  0x16   :  { %v33_v2 = vand.u32 31, %v28_v1  ;;  %v26_v9 = vcvt.s32.f32 %v23_v8  ;;  %s335_s19 = scalar_lea.vmem %s279_s18, 128  ;;  %p340_p9 = scmp.lt.s32.totalorder %s279_s18, %s279_s18 }
  0x17   :  { %p336_p8 = scmp.ne.s32.totalorder %s279_s18, %s335_s19  ;;  %p341_p10 = scmp.lt.s32.totalorder %s335_s19, %s335_s19 }
  0x18   :  { %v391_v3 = vand.u32 1, %v33_v2 }
  0x19   :  { %p342_p11 = por %p341_p10, %p340_p9 }
  0x1a   :  { %v53_v4 = vsub.s32 %v33_v2, %v391_v3 }
  0x1b   :  { %p343_p12 = pnand %p342_p11, %p336_p8 }
  0x1c   :  { %v54_v5 = vcvt.s32.f32 %v53_v4 }
  0x1e   :  { %v55_v6 = vmul.f32 -0.28782314, %v54_v5 }
  0x20   :  { %v56_v7 = vmul.f32 1.442695, %v55_v6 }
  0x22   :  { %307 = vpow2.f32 %v56_v7 }
  0x2c   :  { %v308_v10 = vpop.eup %307 }
  0x2d   :  { %v394_v11 = vmul.f32 %v308_v10, %v26_v9 }
  0x2f   :  { %v63_v12 = vand.u32 2139095040, %v394_v11  ;;  %v60_v14 = vand.u32 2147483647, %v394_v11  ;;  %vm62_vm7 = vcmp.lt.s32.totalorder %v394_v11, 0  ;;  %vm152_vm15 = vweird.f32 %v394_v11 }
  0x31   :  { %v64_v13 = vshrl.u32 %v63_v12, 23  ;;  %v67_v17 = vand.u32 8388607, %v60_v14  ;;  %vm61_vm8 = vcmp.le.f32.partialorder %v60_v14, 0.7853982 }
  0x33   :  { %v287_v15 = vadd.s32 4294967169, %v64_v13  ;;  %v68_v20 = vor.u32 8388608, %v67_v17 }
  0x35   :  { %v70_v16 = vadd.s32 1, %v287_v15  ;;  %v108_v40 = vshll.u32 %v68_v20, 8 }
  0x37   :  { %vm71_vm0 = vcmp.gt.s32.totalorder %v70_v16, 0 }
  0x38   :  { %v72_v18 = vsel %vm71_vm0, %v70_v16, 0  ;;  %vm59_vm0 = vcmp.eq.s32.totalorder %v391_v3, 0 }
  0x39   :  { %v74_v19 = vand.u32 31, %v72_v18  ;;  %v73_v21 = vshrl.u32 %v72_v18, 5 }
  0x3b   :  { %v75_v22 = vsub.s32 32, %v74_v19  ;;  %v77_v24 = vshll.u32 %v362_v23, %v74_v19  ;;  %v80_v26 = vshll.u32 %v363_v25, %v74_v19  ;;  %v83_v28 = vshll.u32 %v364_v27, %v74_v19 }
  0x3c   :  { %v86_v30 = vshll.u32 %v365_v29, %v74_v19  ;;  %v89_v32 = vshll.u32 %v366_v31, %v74_v19  ;;  %vm92_vm1 = vcmp.lt.s32.totalorder %v73_v21, 1  ;;  %vm95_vm2 = vcmp.lt.s32.totalorder %v73_v21, 4 }
  0x3d   :  { %v76_v33 = vshrl.u32 %v362_v23, %v75_v22  ;;  %v78_v34 = vshrl.u32 %v363_v25, %v75_v22  ;;  %v81_v35 = vshrl.u32 %v364_v27, %v75_v22  ;;  %v84_v36 = vshrl.u32 %v365_v29, %v75_v22 }
  0x3e   :  { %v87_v37 = vshrl.u32 %v366_v31, %v75_v22  ;;  %v90_v39 = vshrl.u32 %v367_v38, %v75_v22  ;;  %vm93_vm3 = vcmp.lt.s32.totalorder %v73_v21, 2  ;;  %vm94_vm4 = vcmp.lt.s32.totalorder %v73_v21, 3 }
  0x3f   :  { %v79_v41 = vor.u32 %v78_v34, %v77_v24  ;;  %v82_v42 = vor.u32 %v81_v35, %v80_v26  ;;  %v85_v43 = vor.u32 %v84_v36, %v83_v28 }
  0x40   :  { %v88_v44 = vor.u32 %v87_v37, %v86_v30  ;;  %v91_v45 = vor.u32 %v90_v39, %v89_v32 }
  0x41   :  { %v96_v46 = vsel %vm92_vm1, %v76_v33, %v79_v41  ;;  %v97_v47 = vsel %vm95_vm2, %v85_v43, 2102212464  ;;  %v100_v48 = vsel %vm92_vm1, %v79_v41, %v82_v42  ;;  %v104_v49 = vsel %vm92_vm1, %v82_v42, %v85_v43 }
  0x42   :  { %v98_v50 = vsel %vm94_vm4, %v82_v42, %v97_v47  ;;  %v101_v51 = vsel %vm95_vm2, %v88_v44, 920167782  ;;  %v105_v52 = vsel %vm95_vm2, %v91_v45, 1326507024  ;;  %vm270_vm1 = vcmask 523264  }
  0x43   :  { %v102_v53 = vsel %vm94_vm4, %v85_v43, %v101_v51  ;;  %v106_v54 = vsel %vm94_vm4, %v88_v44, %v105_v52  ;;  %v99_v55 = vsel %vm93_vm3, %v96_v46, %v98_v50  ;;  %v268_v44 = vld [vmem:[#allocation2] sm:$0xff] }
  0x44   :  { %v103_v56 = vsel %vm93_vm3, %v100_v48, %v102_v53  ;;  %v107_v57 = vsel %vm93_vm3, %v104_v49, %v106_v54  ;;  %v115_v62 = vmul.u32 %v108_v40, %v99_v55 }
  0x45   :  { %v400_v58 = vmul.u32.u64.low %v108_v40, %v107_v57  ;;  %v401_v59 = vmul.u32.u64.high %v108_v40, %v107_v57, %v400_v58  ;;  %v403_v60 = vmul.u32.u64.low %v108_v40, %v103_v56  ;;  %v404_v61 = vmul.u32.u64.high %v108_v40, %v103_v56, %v403_v60 }
  0x47   :  { %vm117_vm5 = vc.u32 %v401_v59, %v403_v60  ;;  %v118_v63 = vadd.s32 1, %v404_v61  ;;  %v116_v12 = vadd.s32 %v403_v60, %v401_v59 }
  0x49   :  { %v119_v0 = vsel %vm117_vm5, %v118_v63, %v404_v61 }
  0x4a   :  { %v120_v1 = vadd.s32 %v119_v0, %v115_v62 }
  0x4c   :  { %v121_v2 = vadd.s32 536870912, %v120_v1 }
  0x4e   :  { %v122_v4 = vshrl.u32 %v121_v2, 30 }
  0x50   :  { %v123_v5 = vshll.u32 %v122_v4, 30  ;;  %v146_v25 = vsub.s32 4, %v122_v4 }
  0x52   :  { %v124_v6 = vsub.s32 %v120_v1, %v123_v5  ;;  %v147_v28 = vsel %vm62_vm7, %v146_v25, %v122_v4 }
  0x53   :  { %v149_v31 = vsel %vm61_vm8, 0, %v147_v28 }
  0x54   :  { %v126_v7 = vsub.s32 0, %v124_v6  ;;  %v153_v32 = vadd.s32 3, %v149_v31  ;;  %v257_v34 = vand.u32 3, %v149_v31 }
  0x56   :  { %v288_v8 = vmin.u32 %v126_v7, %v124_v6  ;;  %v154_v33 = vand.u32 3, %v153_v32  ;;  %vm262_vm10 = vcmp.eq.s32.totalorder %v257_v34, 2  ;;  %vm259_vm12 = vcmp.eq.s32.totalorder %v257_v34, 0 }
  0x57   :  { %vm258_vm14 = vcmp.lt.s32.totalorder %v257_v34, 2 }
  0x58   :  { %v128_v9 = vclz %v288_v8  ;;  %vm159_vm9 = vcmp.eq.s32.totalorder %v154_v33, 2  ;;  %vm156_vm11 = vcmp.eq.s32.totalorder %v154_v33, 0  ;;  %vm155_vm13 = vcmp.lt.s32.totalorder %v154_v33, 2 }
  0x5a   :  { %v289_v10 = vadd.s32 4294967294, %v128_v9 }
  0x5c   :  { %vm290_vm6 = vcmp.lt.s32.totalorder %v289_v10, 0 }
  0x5d   :  { %v131_v13 = vsel %vm290_vm6, 0, %v289_v10 }
  0x5e   :  { %v132_v15 = vsub.s32 32, %v131_v13  ;;  %v133_v16 = vshll.u32 %v124_v6, %v131_v13  ;;  %v136_v17 = vsub.s32 4294967266, %v131_v13 }
  0x60   :  { %v134_v18 = vshrl.u32 %v116_v12, %v132_v15  ;;  %v137_v19 = vadd.s32 127, %v136_v17 }
  0x62   :  { %v135_v20 = vor.u32 %v134_v18, %v133_v16  ;;  %v138_v21 = vshll.u32 %v137_v19, 23 }
  0x64   :  { %v139_v22 = vor.u32 4788187, %v138_v21  ;;  %v142_v23 = vcvt.s32.f32 %v135_v20 }
  0x66   :  { %v140_v24 = vand.u32 2147483647, %v139_v22 }
  0x68   :  { %v143_v26 = vmul.f32 %v142_v23, %v140_v24 }
  0x6a   :  { %v144_v27 = vxor.u32 2147483648, %v143_v26 }
  0x6c   :  { %v145_v29 = vsel %vm62_vm7, %v144_v27, %v143_v26 }
  0x6d   :  { %v148_v30 = vsel %vm61_vm8, %v394_v11, %v145_v29 }
  0x6e   :  { %309 = vcosq.f32 %v148_v30 }
  0x6f   :  { %311 = vsinq.f32 %v148_v30 }
  0x78   :  { %v310_v35 = vpop.eup %309 }
  0x79   :  { %v312_v36 = vpop.eup %311  ;;  %v160_v37 = vxor.u32 2147483648, %v310_v35 }
  0x7a   :  { %v157_v14 = vxor.u32 2147483648, %v312_v36 }
  0x7b   :  { %v161_v38 = vsel %vm159_vm9, %v160_v37, %v312_v36  ;;  %v264_v39 = vsel %vm262_vm10, %v160_v37, %v312_v36 }
  0x7c   :  { %v158_v40 = vsel %vm156_vm11, %v310_v35, %v157_v14  ;;  %v261_v41 = vsel %vm259_vm12, %v310_v35, %v157_v14 }
  0x7d   :  { %v162_v42 = vsel %vm155_vm13, %v158_v40, %v161_v38  ;;  %v265_v43 = vsel %vm258_vm14, %v261_v41, %v264_v39 }
  0x7e   :  { %v163_v45 = vsel %vm152_vm15, nan, %v162_v42  ;;  %v266_v46 = vsel %vm152_vm15, nan, %v265_v43 }
  0x7f   :  { %v267_v47 = vsel %vm59_vm0, %v163_v45, %v266_v46 }
  0x80   :  { %v269_v48 = vadd.f32 %v268_v44, %v267_v47 }
  0x82   :  { %271 = vst.msk [vmem:[#allocation5] sm:$0xff] %vm270_vm1, %v269_v48 }
  0x83   :  { %346 = shalt.err (!%p343_p12)
}
  0x84   :  { %s347_s22 = scalar_lea.hbm %s429_s1, 128 }
  0x85   :  { %p348_p13 = scmp.ne.s32.totalorder %s429_s1, %s347_s22  ;;  %p351_p0 = scmp.lt.u32.totalorder %s347_s22, %s429_s1 }
  0x87   :  { %p353_p1 = pnand %p351_p0, %p348_p13 }
  0x89   :  { %356 = shalt.err (!%p353_p1)
}
  0x8a   :  { %281 = dma.vmem_to_hbm [thread:$0]  %s279_s18, 128, %s429_s1, [#allocation4]  }
  0x8b   :  { %359 = dma.done.wait [#allocation4], 128  }
  0x8c   :  { %360 = vsyncadd [#allocation4], 4294967168 }
  0x8d   :  { %285 = vsyncpa [#allocation3], 1 }
  0x8e   :  { %286 = vsyncpa [#allocation4], 1 }

</bundles_post_ra>
